<compile_context>
chip_gen: v6e
topology: v6e:2x2x1
jax: 0.10.0
libtpu: 0.0.40
codegen_flags: <defaults>
</compile_context>

<pallas_src>
import jax
import jax.numpy as jnp
from jax.experimental import pallas as pl
from jax.experimental.pallas import tpu as pltpu


_LANE = 128                       # vreg lane width / padded feature width
_N_LAYERS = 5
_BIAS_ROW0 = _N_LAYERS * _LANE    # 640
_SLAB_ROWS = _BIAS_ROW0 + 8       # 648 rows (multiple of 8)
_MAX_TILE_B = 2048                # batch tile cap (well within 32 MiB VMEM budget)


def _round_up(n, m):
    return ((n + m - 1) // m) * m


# ---------------------------------------------------------------------------
# Kernel
# ---------------------------------------------------------------------------
def _mlp_kernel(x_ref, p_ref, o_ref):
    """One batch tile of the MLP.

    x_ref: (TILE_B, 92)  raw f32 inputs (natural width, no pre-padding)
    p_ref: (648, 128)    packed params (compute dtype), resident in VMEM:
                         rows [i*128,(i+1)*128) = zero-padded weight i,
                         rows [640,648) = zero-padded biases.
    o_ref: (TILE_B, 1)   f32 output (lane-dense, no post-slice needed)
    """
    cdt = p_ref.dtype                 # compute dtype: f32 or bf16
    in_dim = x_ref.shape[1]           # 92 (static)

    # All 5 biases in one aligned (8, 128) load; sliced per layer below.
    biases = p_ref[pl.ds(_BIAS_ROW0, 8), :].astype(jnp.float32)

    h = x_ref[...].astype(cdt)        # (T, 92)
    out = None
    for i in range(_N_LAYERS):
        # Layer 0 contracts over the real 92 rows of the padded W1 block
        # (same single MXU pass as K=128, but no padded copy of x is needed).
        k = in_dim if i == 0 else _LANE
        w = p_ref[pl.ds(i * _LANE, k), :]                        # (k, 128)
        z = jnp.dot(h, w, preferred_element_type=jnp.float32)    # f32 accumulate
        z = z + biases[i : i + 1, :]
        if i < _N_LAYERS - 1:
            # Zero padding in the unused output columns is exactly preserved
            # through x@W+b (padded cols of W and b are 0) and ReLU.
            h = jnp.maximum(z, 0.0).astype(cdt)
        else:
            out = z
    o_ref[...] = out[:, :1].astype(o_ref.dtype)                  # real result = lane 0


# ---------------------------------------------------------------------------
# One-time parameter packing (call ONCE at init, reuse the slab per forward)
# ---------------------------------------------------------------------------
def pack_params(params, dtype=jnp.float32):
    """Pack 5 (W, b) pairs into one (648, 128) lane-dense slab.

    W is shaped (fan_in, fan_out) (transpose of the PyTorch nn.Linear weight);
    weight i occupies rows [i*128,(i+1)*128) zero-padded, bias i is row 640+i.
    """
    assert len(params) == _N_LAYERS
    blocks = []
    biases = jnp.zeros((8, _LANE), jnp.float32)
    for i, (w, b) in enumerate(params):
        fan_in, fan_out = w.shape
        wp = jnp.zeros((_LANE, _LANE), jnp.float32).at[:fan_in, :fan_out].set(
            w.astype(jnp.float32))
        blocks.append(wp)
        biases = biases.at[i, :fan_out].set(jnp.reshape(b, (-1,)).astype(jnp.float32))
    blocks.append(biases)
    return jnp.concatenate(blocks, axis=0).astype(dtype)   # (648, 128)


# ---------------------------------------------------------------------------
# Forward
# ---------------------------------------------------------------------------
def _choose_tile_b(batch):
    tile = min(_MAX_TILE_B, _round_up(max(batch, 1), 8))
    steps = pl.cdiv(batch, tile)
    if steps == 1 and batch >= 256:
        # Give both v7x TensorCores work once per-core work beats step overhead.
        tile = _round_up(pl.cdiv(batch, 2), 8)
    elif steps > 2 and steps % 2 == 1:
        # Keep the step count even so the megacore split is balanced.
        tile = _round_up(pl.cdiv(batch, steps + 1), 8)
    return tile


def neural_net_forward(x, slab):
    """Forward pass of NeuralNet.

    x:    (batch, 92) float32
    slab: (648, 128) packed parameters from pack_params() (f32 or bf16)
    returns (batch, 1) float32
    """
    batch, in_dim = x.shape
    tile_b = _choose_tile_b(batch)
    grid = (pl.cdiv(batch, tile_b),)

    flops = 2 * batch * _N_LAYERS * _LANE * _LANE          # padded flops
    bytes_accessed = (x.size * x.dtype.itemsize
                      + slab.size * slab.dtype.itemsize
                      + batch * 4)

    return pl.pallas_call(
        _mlp_kernel,
        out_shape=jax.ShapeDtypeStruct((batch, 1), jnp.float32),
        grid=grid,
        in_specs=[
            # x tile at natural 92-wide last dim (full dim -> legal BlockSpec).
            pl.BlockSpec((tile_b, in_dim), lambda i: (i, 0)),
            # Parameter slab: constant index_map -> DMA'd once, resident in VMEM.
            pl.BlockSpec((_SLAB_ROWS, _LANE), lambda i: (0, 0)),
        ],
        out_specs=pl.BlockSpec((tile_b, 1), lambda i: (i, 0)),
        compiler_params=pltpu.CompilerParams(
            dimension_semantics=("parallel",),
            vmem_limit_bytes=32 * 1024 * 1024),
        cost_estimate=pl.CostEstimate(
            flops=flops, transcendentals=0, bytes_accessed=bytes_accessed),
    )(x, slab)


# ---------------------------------------------------------------------------
# Reference / init helpers
# ---------------------------------------------------------------------------
def init_params(key, dims):
    """Deterministic init mimicking nn.Linear's uniform(-1/sqrt(fan_in), 1/sqrt(fan_in))."""
    params = []
    for fan_in, fan_out in zip(dims[:-1], dims[1:]):
        key, kw, kb = jax.random.split(key, 3)
        bound = 1.0 / jnp.sqrt(fan_in)
        w = jax.random.uniform(kw, (fan_in, fan_out), jnp.float32, -bound, bound)
        b = jax.random.uniform(kb, (1, fan_out), jnp.float32, -bound, bound)
        params.append((w, b))
    return params


def reference_forward(x, params):
    h = x
    for i, (w, b) in enumerate(params):
        h = h @ w + b
        if i < len(params) - 1:
            h = jnp.maximum(h, 0.0)
    return h


if __name__ == "__main__":
    key = jax.random.PRNGKey(0)
    k_x, k_p = jax.random.split(key)

    batch, input_dim = 8, 92
    x = jax.random.normal(k_x, (batch, input_dim), jnp.float32)

    dims = [input_dim, 32, 64, 32, 8, 1]
    params = init_params(k_p, dims)
    ref = reference_forward(x, params)

    fwd = jax.jit(neural_net_forward)

    # f32 compute path (default, strict check).
    slab_f32 = pack_params(params, jnp.float32)     # built ONCE, reused per call
    out = jax.block_until_ready(fwd(x, slab_f32))
    assert out.shape == (batch, 1)
    assert jnp.allclose(out, ref, atol=1e-4, rtol=1e-4), "f32 mismatch vs JAX reference"

    # bf16 compute path (v6e/v7x fast path: single-pass MXU, half the slab DMA).
    slab_bf16 = pack_params(params, jnp.bfloat16)
    out_bf16 = jax.block_until_ready(fwd(x, slab_bf16))
    assert out_bf16.shape == (batch, 1)
    assert jnp.all(jnp.isfinite(out_bf16))
    assert jnp.allclose(out_bf16, ref, atol=1e-1, rtol=1e-1), "bf16 mismatch vs JAX reference"

    print("KERNEL_OK")
</pallas_src>

<mosaic_0001>
module attributes {stable_mosaic.version = 11 : i64} {
  func.func @_mlp_kernel(%arg0: i32, %arg1: memref<8x92xf32, #tpu.memory_space<vmem>>, %arg2: memref<648x128xf32, #tpu.memory_space<vmem>>, %arg3: memref<8x1xf32, #tpu.memory_space<vmem>>) attributes {dimension_semantics = [#tpu.dimension_semantics<parallel>], iteration_bounds = array<i64: 1>, scalar_prefetch = 0 : i64, scratch_operands = 0 : i64, tpu.core_type = #tpu.core_type<tc>, window_params = [{transform_indices = @transform_0, window_bounds = array<i64: 8, 92>}, {pipeline_mode = #tpu.pipeline_mode<synchronous>, transform_indices = @transform_1, window_bounds = array<i64: 648, 128>}, {transform_indices = @transform_2, window_bounds = array<i64: 8, 1>}]} {
    %c640 = arith.constant 640 : index
    %c0 = arith.constant 0 : index
    %0 = vector.load %arg2[%c640, %c0] : memref<648x128xf32, #tpu.memory_space<vmem>>, vector<8x128xf32>
    %c0_0 = arith.constant 0 : index
    %c0_1 = arith.constant 0 : index
    %1 = vector.load %arg1[%c0_0, %c0_1] : memref<8x92xf32, #tpu.memory_space<vmem>>, vector<8x92xf32>
    %c0_2 = arith.constant 0 : index
    %c0_3 = arith.constant 0 : index
    %2 = vector.load %arg2[%c0_2, %c0_3] : memref<648x128xf32, #tpu.memory_space<vmem>>, vector<92x128xf32>
    %cst = arith.constant dense<0.000000e+00> : vector<8x128xf32>
    %3 = tpu.matmul %1, %2, %cst {dimension_numbers = #tpu.dot_dimension_numbers<[1], [0], [0], [1], [0, 0, 1, 1], [], []>} : vector<8x92xf32>, vector<92x128xf32>, vector<8x128xf32> -> vector<8x128xf32>
    %4 = vector.extract_strided_slice %0 {offsets = [0, 0], sizes = [1, 128], strides = [1, 1]} : vector<8x128xf32> to vector<1x128xf32>
    %5 = vector.broadcast %4 : vector<1x128xf32> to vector<8x128xf32>
    %6 = arith.addf %3, %5 : vector<8x128xf32>
    %cst_4 = arith.constant 0.000000e+00 : f32
    %7 = vector.broadcast %cst_4 : f32 to vector<8x128xf32>
    %8 = arith.maximumf %6, %7 : vector<8x128xf32>
    %c128 = arith.constant 128 : index
    %c0_5 = arith.constant 0 : index
    %9 = vector.load %arg2[%c128, %c0_5] : memref<648x128xf32, #tpu.memory_space<vmem>>, vector<128x128xf32>
    %cst_6 = arith.constant dense<0.000000e+00> : vector<8x128xf32>
    %10 = tpu.matmul %8, %9, %cst_6 {dimension_numbers = #tpu.dot_dimension_numbers<[1], [0], [0], [1], [0, 0, 1, 1], [], []>} : vector<8x128xf32>, vector<128x128xf32>, vector<8x128xf32> -> vector<8x128xf32>
    %11 = vector.extract_strided_slice %0 {offsets = [1, 0], sizes = [1, 128], strides = [1, 1]} : vector<8x128xf32> to vector<1x128xf32>
    %12 = vector.broadcast %11 : vector<1x128xf32> to vector<8x128xf32>
    %13 = arith.addf %10, %12 : vector<8x128xf32>
    %cst_7 = arith.constant 0.000000e+00 : f32
    %14 = vector.broadcast %cst_7 : f32 to vector<8x128xf32>
    %15 = arith.maximumf %13, %14 : vector<8x128xf32>
    %c256 = arith.constant 256 : index
    %c0_8 = arith.constant 0 : index
    %16 = vector.load %arg2[%c256, %c0_8] : memref<648x128xf32, #tpu.memory_space<vmem>>, vector<128x128xf32>
    %cst_9 = arith.constant dense<0.000000e+00> : vector<8x128xf32>
    %17 = tpu.matmul %15, %16, %cst_9 {dimension_numbers = #tpu.dot_dimension_numbers<[1], [0], [0], [1], [0, 0, 1, 1], [], []>} : vector<8x128xf32>, vector<128x128xf32>, vector<8x128xf32> -> vector<8x128xf32>
    %18 = vector.extract_strided_slice %0 {offsets = [2, 0], sizes = [1, 128], strides = [1, 1]} : vector<8x128xf32> to vector<1x128xf32>
    %19 = vector.broadcast %18 : vector<1x128xf32> to vector<8x128xf32>
    %20 = arith.addf %17, %19 : vector<8x128xf32>
    %cst_10 = arith.constant 0.000000e+00 : f32
    %21 = vector.broadcast %cst_10 : f32 to vector<8x128xf32>
    %22 = arith.maximumf %20, %21 : vector<8x128xf32>
    %c384 = arith.constant 384 : index
    %c0_11 = arith.constant 0 : index
    %23 = vector.load %arg2[%c384, %c0_11] : memref<648x128xf32, #tpu.memory_space<vmem>>, vector<128x128xf32>
    %cst_12 = arith.constant dense<0.000000e+00> : vector<8x128xf32>
    %24 = tpu.matmul %22, %23, %cst_12 {dimension_numbers = #tpu.dot_dimension_numbers<[1], [0], [0], [1], [0, 0, 1, 1], [], []>} : vector<8x128xf32>, vector<128x128xf32>, vector<8x128xf32> -> vector<8x128xf32>
    %25 = vector.extract_strided_slice %0 {offsets = [3, 0], sizes = [1, 128], strides = [1, 1]} : vector<8x128xf32> to vector<1x128xf32>
    %26 = vector.broadcast %25 : vector<1x128xf32> to vector<8x128xf32>
    %27 = arith.addf %24, %26 : vector<8x128xf32>
    %cst_13 = arith.constant 0.000000e+00 : f32
    %28 = vector.broadcast %cst_13 : f32 to vector<8x128xf32>
    %29 = arith.maximumf %27, %28 : vector<8x128xf32>
    %c512 = arith.constant 512 : index
    %c0_14 = arith.constant 0 : index
    %30 = vector.load %arg2[%c512, %c0_14] : memref<648x128xf32, #tpu.memory_space<vmem>>, vector<128x128xf32>
    %cst_15 = arith.constant dense<0.000000e+00> : vector<8x128xf32>
    %31 = tpu.matmul %29, %30, %cst_15 {dimension_numbers = #tpu.dot_dimension_numbers<[1], [0], [0], [1], [0, 0, 1, 1], [], []>} : vector<8x128xf32>, vector<128x128xf32>, vector<8x128xf32> -> vector<8x128xf32>
    %32 = vector.extract_strided_slice %0 {offsets = [4, 0], sizes = [1, 128], strides = [1, 1]} : vector<8x128xf32> to vector<1x128xf32>
    %33 = vector.broadcast %32 : vector<1x128xf32> to vector<8x128xf32>
    %34 = arith.addf %31, %33 : vector<8x128xf32>
    %35 = vector.extract_strided_slice %34 {offsets = [0, 0], sizes = [8, 1], strides = [1, 1]} : vector<8x128xf32> to vector<8x1xf32>
    %c0_16 = arith.constant 0 : index
    %c0_17 = arith.constant 0 : index
    %36 = vector.load %arg3[%c0_16, %c0_17] : memref<8x1xf32, #tpu.memory_space<vmem>>, vector<8x1xf32>
    tpu.vector_store %arg3[%c0_16, %c0_17], %35 {strides = array<i32>} : memref<8x1xf32, #tpu.memory_space<vmem>>, vector<8x1xf32>,
    return
  }
  func.func @transform_0(%arg0: i32) -> (i32, i32) {
    %c0_i32 = arith.constant 0 : i32
    %c0_i32_0 = arith.constant 0 : i32
    return %arg0, %c0_i32 : i32, i32
  }
  func.func @transform_1(%arg0: i32) -> (i32, i32) {
    %c0_i32 = arith.constant 0 : i32
    %c0_i32_0 = arith.constant 0 : i32
    %c0_i32_1 = arith.constant 0 : i32
    return %c0_i32, %c0_i32_0 : i32, i32
  }
  func.func @transform_2(%arg0: i32) -> (i32, i32) {
    %c0_i32 = arith.constant 0 : i32
    %c0_i32_0 = arith.constant 0 : i32
    return %arg0, %c0_i32 : i32, i32
  }
}

</mosaic_0001>

<bundles_post_ra>
// kernel: neural_net_forward.1
= control target key start
LH: loop header
LB: loop body
LE: loop exit
PB: predicated region body
PF: predicated region fallthrough
CT: control target
= control target key end

     0   :  { %7 = vsyncpa [#allocation3], 0  ;;  %s935_s0 = inlined_call_operand.hbm [shape: f32[8,92], index: 0, kind: input, shape index: {}]   ;;  %s936_s1 = inlined_call_operand.hbm [shape: f32[648,128], index: 1, kind: input, shape index: {}]   ;;  %s937_s2 = inlined_call_operand.vmem [shape: f32[8,1], index: 2, kind: output, shape index: {}]  }
   0x1   :  { %8 = vsyncpa [#allocation5], 0  ;;  %s805_s9 = smov [#allocation2]   ;;  %s806_s11 = smov [#allocation4]  }
   0x2   :  { %s15_s10 = sshll.u32 %s805_s9, 4  ;;  %s24_s12 = sshll.u32 %s806_s11, 4  ;;  %s16_s10 = int_to_ptr.vmem [resolvable:$true] %s15_s10  ;;  %s25_s12 = int_to_ptr.vmem [resolvable:$true] %s24_s12 }
   0x3   :  { %s769_s13 = scalar_lea.vmem %s16_s10, 128  ;;  %p774_p1 = scmp.lt.s32.totalorder %s16_s10, %s16_s10 }
   0x4   :  { %p770_p0 = scmp.ne.s32.totalorder %s16_s10, %s769_s13  ;;  %p775_p2 = scmp.lt.s32.totalorder %s769_s13, %s769_s13 }
   0x6   :  { %p776_p3 = por %p775_p2, %p774_p1 }
   0x8   :  { %p777_p4 = pnand %p776_p3, %p770_p0 }
   0xa   :  { %780 = shalt.err (!%p777_p4)
}
   0xb   :  { %18 = dma.hbm_to_vmem [thread:$0]  %s935_s0, 128, %s16_s10, [#allocation3]  }
   0xc   :  { %s789_s16 = scalar_lea.vmem %s25_s12, 10368  ;;  %p794_p6 = scmp.lt.s32.totalorder %s25_s12, %s25_s12 }
   0xd   :  { %p790_p5 = scmp.ne.s32.totalorder %s25_s12, %s789_s16  ;;  %p795_p7 = scmp.lt.s32.totalorder %s789_s16, %s789_s16 }
   0xf   :  { %p796_p8 = por %p795_p7, %p794_p6 }
  0x11   :  { %p797_p9 = pnand %p796_p8, %p790_p5 }
  0x13   :  { %800 = shalt.err (!%p797_p9)
}
  0x14   :  { %s807_s17 = smov 128   ;;  %s808_s18 = smov 8  }
  0x15   :  { %30 = dma.hbm_to_vmem [thread:$0]  %s936_s1, 10368, %s25_s12, [#allocation5], %s807_s17, %s807_s17, %s808_s18  }
  0x16   :  { %801 = dma.done.wait [#allocation3], 128  }
  0x17   :  { %802 = vsyncadd [#allocation3], 4294967168 }
  0x18   :  { %803 = dma.done.wait [#allocation5], 10368  }
  0x19   :  { %804 = vsyncadd [#allocation5], 4294956928  ;;  %v809_v0 = vmov 0.0   ;;  %vm810_vm0 = vmmov 0   ;;  %vm59_vm1 = vcmask 1043456   ;;  %v49_v2 = vld [vmem:[#allocation4 + $0x50] sm:$0xff]  ;;  %v51_v43 = vlaneseq }
  0x1a   :  { %588 = vmatprep.subr.mxu0 %v809_v0  ;;  %612 = vmatprep.mubr.msk.f32.mxu0 %vm810_vm0, %v809_v0  ;;  %v50_v1 = vld [vmem:[#allocation4 + $0x58] sm:$0xf]  ;;  %v48_v3 = vld [vmem:[#allocation4 + $0x48] sm:$0xff]  ;;  %v47_v4 = vld [vmem:[#allocation4 + $0x40] sm:$0xff]  ;;  %vm55_vm2 = vcmask 752640   ;;  %vm497_vm3 = vcmask 7168  }
  0x1b   :  { %615 = vmatprep.subr.mxu1 %v809_v0  ;;  %647 = vmatprep.mubr.msk.f32.mxu1 %vm810_vm0, %v809_v0  ;;  %v149_v5 = vld [vmem:[#allocation4 + $0xf8] sm:$0xff]  ;;  %v148_v6 = vld [vmem:[#allocation4 + $0xf0] sm:$0xff]  ;;  %v147_v8 = vld [vmem:[#allocation4 + $0xe8] sm:$0xff]  ;;  %v881_v44 = vshrl.u32 %v51_v43, 7 }
  0x1c   :  { %589 = vmatpush3.msk.msra.mxu0 %vm59_vm1, %v50_v1  ;;  %616 = vmatpush3.msra.mxu1 %v149_v5  ;;  %v46_v7 = vld [vmem:[#allocation4 + $0x38] sm:$0xff]  ;;  %v45_v9 = vld [vmem:[#allocation4 + $0x30] sm:$0xff]  ;;  %v146_v10 = vld [vmem:[#allocation4 + $0xe0] sm:$0xff] }
  0x1d   :  { %590 = vmatprep.subr.mxu0 %v809_v0  ;;  %617 = vmatprep.subr.mxu1 %v809_v0  ;;  %v44_v11 = vld [vmem:[#allocation4 + $0x28] sm:$0xff]  ;;  %v145_v12 = vld [vmem:[#allocation4 + $0xd8] sm:$0xff]  ;;  %v43_v13 = vld [vmem:[#allocation4 + $0x20] sm:$0xff]  ;;  %v53_v45 = vsub.s32 0, %v881_v44  ;;  %v152_v5 = vsub.s32 1, %v881_v44 }
  0x1e   :  { %591 = vmatpush3.msra.mxu0 %v49_v2  ;;  %618 = vmatpush3.msra.mxu1 %v148_v6  ;;  %v144_v14 = vld [vmem:[#allocation4 + $0xd0] sm:$0xff]  ;;  %v42_v15 = vld [vmem:[#allocation4 + $0x18] sm:$0xff]  ;;  %v143_v16 = vld [vmem:[#allocation4 + $0xc8] sm:$0xff] }
  0x1f   :  { %592 = vmatprep.subr.mxu0 %v809_v0  ;;  %619 = vmatprep.subr.mxu1 %v809_v0  ;;  %v41_v17 = vld [vmem:[#allocation4 + $0x10] sm:$0xff]  ;;  %v142_v18 = vld [vmem:[#allocation4 + $0xc0] sm:$0xff]  ;;  %v40_v19 = vld [vmem:[#allocation4 + $0x8] sm:$0xff] }
  0x20   :  { %593 = vmatpush3.msra.mxu0 %v48_v3  ;;  %620 = vmatpush3.msra.mxu1 %v147_v8  ;;  %v141_v20 = vld [vmem:[#allocation4 + $0xb8] sm:$0xff]  ;;  %v39_v21 = vld [vmem:[#allocation4] sm:$0xff]  ;;  %v140_v22 = vld [vmem:[#allocation4 + $0xb0] sm:$0xff] }
  0x21   :  { %594 = vmatprep.subr.mxu0 %v809_v0  ;;  %621 = vmatprep.subr.mxu1 %v809_v0  ;;  %v38_v23 = vld [vmem:[#allocation2] sm:$0xff]  ;;  %v139_v24 = vld [vmem:[#allocation4 + $0xa8] sm:$0xff]  ;;  %v138_v25 = vld [vmem:[#allocation4 + $0xa0] sm:$0xff] }
  0x22   :  { %595 = vmatpush3.msra.mxu0 %v47_v4  ;;  %622 = vmatpush3.msra.mxu1 %v146_v10  ;;  %v137_v26 = vld [vmem:[#allocation4 + $0x98] sm:$0xff]  ;;  %v136_v27 = vld [vmem:[#allocation4 + $0x90] sm:$0xff]  ;;  %v135_v28 = vld [vmem:[#allocation4 + $0x88] sm:$0xff] }
  0x23   :  { %596 = vmatprep.subr.mxu0 %v809_v0  ;;  %623 = vmatprep.subr.mxu1 %v809_v0  ;;  %v134_v29 = vld [vmem:[#allocation4 + $0x80] sm:$0xff]  ;;  %v240_v30 = vld [vmem:[#allocation4 + $0x178] sm:$0xff]  ;;  %v239_v31 = vld [vmem:[#allocation4 + $0x170] sm:$0xff] }
  0x24   :  { %597 = vmatpush3.msra.mxu0 %v46_v7  ;;  %624 = vmatpush3.msra.mxu1 %v145_v12  ;;  %v238_v32 = vld [vmem:[#allocation4 + $0x168] sm:$0xff]  ;;  %v237_v33 = vld [vmem:[#allocation4 + $0x160] sm:$0xff]  ;;  %v236_v34 = vld [vmem:[#allocation4 + $0x158] sm:$0xff] }
  0x25   :  { %598 = vmatprep.subr.mxu0 %v809_v0  ;;  %625 = vmatprep.subr.mxu1 %v809_v0  ;;  %v235_v35 = vld [vmem:[#allocation4 + $0x150] sm:$0xff]  ;;  %v234_v36 = vld [vmem:[#allocation4 + $0x148] sm:$0xff]  ;;  %v233_v37 = vld [vmem:[#allocation4 + $0x140] sm:$0xff] }
  0x26   :  { %599 = vmatpush3.msra.mxu0 %v45_v9  ;;  %626 = vmatpush3.msra.mxu1 %v144_v14  ;;  %v232_v38 = vld [vmem:[#allocation4 + $0x138] sm:$0xff]  ;;  %v231_v39 = vld [vmem:[#allocation4 + $0x130] sm:$0xff]  ;;  %v230_v40 = vld [vmem:[#allocation4 + $0x128] sm:$0xff] }
  0x27   :  { %600 = vmatprep.subr.mxu0 %v809_v0  ;;  %627 = vmatprep.subr.mxu1 %v809_v0  ;;  %v229_v41 = vld [vmem:[#allocation4 + $0x120] sm:$0xff]  ;;  %v228_v42 = vld [vmem:[#allocation4 + $0x118] sm:$0xff]  ;;  %v227_v52 = vld [vmem:[#allocation4 + $0x110] sm:$0xff] }
  0x28   :  { %601 = vmatpush3.msra.mxu0 %v44_v11  ;;  %628 = vmatpush3.msra.mxu1 %v143_v16  ;;  %v884_v46 = vld [vmem:[#allocation4 + $0x280] sm:$0xff]  ;;  %v226_v53 = vld [vmem:[#allocation4 + $0x108] sm:$0xff]  ;;  %v331_v55 = vld [vmem:[#allocation4 + $0x1f8] sm:$0xff] }
  0x29   :  { %602 = vmatprep.subr.mxu0 %v809_v0  ;;  %629 = vmatprep.subr.mxu1 %v809_v0  ;;  %v54_v47 = vrot.slane %v884_v46, %v53_v45  ;;  %v225_v54 = vld [vmem:[#allocation4 + $0x100] sm:$0xff]  ;;  %v330_v56 = vld [vmem:[#allocation4 + $0x1f0] sm:$0xff]  ;;  %v329_v57 = vld [vmem:[#allocation4 + $0x1e8] sm:$0xff]  ;;  %v153_v6 = vrot.slane %v884_v46, %v152_v5 }
  0x2a   :  { %603 = vmatpush3.msra.mxu0 %v43_v13  ;;  %630 = vmatpush3.msra.mxu1 %v142_v18  ;;  %v328_v58 = vld [vmem:[#allocation4 + $0x1e0] sm:$0xff]  ;;  %v327_v59 = vld [vmem:[#allocation4 + $0x1d8] sm:$0xff]  ;;  %v326_v60 = vld [vmem:[#allocation4 + $0x1d0] sm:$0xff] }
  0x2b   :  { %604 = vmatprep.subr.mxu0 %v809_v0  ;;  %631 = vmatprep.subr.mxu1 %v809_v0  ;;  %v325_v61 = vld [vmem:[#allocation4 + $0x1c8] sm:$0xff]  ;;  %v324_v62 = vld [vmem:[#allocation4 + $0x1c0] sm:$0xff]  ;;  %v323_v63 = vld [vmem:[#allocation4 + $0x1b8] sm:$0xff] }
  0x2c   :  { %605 = vmatpush3.msra.mxu0 %v42_v15  ;;  %632 = vmatpush3.msra.mxu1 %v141_v20  ;;  %v322_v1 = vld [vmem:[#allocation4 + $0x1b0] sm:$0xff]  ;;  %v321_v2 = vld [vmem:[#allocation4 + $0x1a8] sm:$0xff]  ;;  %v320_v3 = vld [vmem:[#allocation4 + $0x1a0] sm:$0xff] }
  0x2d   :  { %606 = vmatprep.subr.mxu0 %v809_v0  ;;  %633 = vmatprep.subr.mxu1 %v809_v0  ;;  %v319_v4 = vld [vmem:[#allocation4 + $0x198] sm:$0xff]  ;;  %v318_v11 = vld [vmem:[#allocation4 + $0x190] sm:$0xff]  ;;  %v317_v12 = vld [vmem:[#allocation4 + $0x188] sm:$0xff] }
  0x2e   :  { %607 = vmatpush3.msra.mxu0 %v41_v17  ;;  %634 = vmatpush3.msra.mxu1 %v140_v22  ;;  %v316_v13 = vld [vmem:[#allocation4 + $0x180] sm:$0xff]  ;;  %v422_v14 = vld [vmem:[#allocation4 + $0x278] sm:$0xff]  ;;  %v421_v15 = vld [vmem:[#allocation4 + $0x270] sm:$0xff] }
  0x2f   :  { %608 = vmatprep.subr.mxu0 %v809_v0  ;;  %635 = vmatprep.subr.mxu1 %v809_v0  ;;  %v420_v16 = vld [vmem:[#allocation4 + $0x268] sm:$0xff]  ;;  %v419_v17 = vld [vmem:[#allocation4 + $0x260] sm:$0xff]  ;;  %v418_v18 = vld [vmem:[#allocation4 + $0x258] sm:$0xff] }
  0x30   :  { %609 = vmatpush3.msra.mxu0 %v40_v19  ;;  %636 = vmatpush3.msra.mxu1 %v139_v24  ;;  %v417_v19 = vld [vmem:[#allocation4 + $0x250] sm:$0xff]  ;;  %v416_v20 = vld [vmem:[#allocation4 + $0x248] sm:$0xff]  ;;  %v414_v22 = vld [vmem:[#allocation4 + $0x238] sm:$0xff] }
  0x31   :  { %610 = vmatprep.subr.mxu0 %v809_v0  ;;  %637 = vmatprep.subr.mxu1 %v809_v0  ;;  %v412_v24 = vld [vmem:[#allocation4 + $0x228] sm:$0xff] }
  0x32   :  { %611 = vmatpush3.msra.mxu0 %v39_v21  ;;  %638 = vmatpush3.msra.mxu1 %v138_v25  ;;  %v415_v21 = vld [vmem:[#allocation4 + $0x240] sm:$0xff] }
  0x33   :  { %613 = vmatmul.mubr.msk.f32.vlgmr.msra.gmra.mxu0 %vm55_vm2, %v38_v23  ;;  %650 = vmatprep.subr.mxu0 %v809_v0  ;;  %v413_v23 = vld [vmem:[#allocation4 + $0x230] sm:$0xff]  ;;  %v411_v25 = vld [vmem:[#allocation4 + $0x220] sm:$0xff] }
  0x34   :  { %682 = vmatprep.mubr.msk.f32.mxu0 %vm810_vm0, %v809_v0  ;;  %639 = vmatprep.subr.mxu1 %v809_v0 }
  0x35   :  { %640 = vmatpush3.msra.mxu1 %v137_v26  ;;  %651 = vmatpush3.msra.mxu0 %v240_v30  ;;  %v410_v26 = vld [vmem:[#allocation4 + $0x218] sm:$0xff] }
  0x36   :  { %641 = vmatprep.subr.mxu1 %v809_v0  ;;  %652 = vmatprep.subr.mxu0 %v809_v0 }
  0x37   :  { %642 = vmatpush3.msra.mxu1 %v136_v27  ;;  %653 = vmatpush3.msra.mxu0 %v239_v31  ;;  %v243_v27 = vsub.s32 2, %v881_v44 }
  0x38   :  { %643 = vmatprep.subr.mxu1 %v809_v0  ;;  %654 = vmatprep.subr.mxu0 %v809_v0 }
  0x39   :  { %644 = vmatpush3.msra.mxu1 %v135_v28  ;;  %655 = vmatpush3.msra.mxu0 %v238_v32  ;;  %v244_v28 = vrot.slane %v884_v46, %v243_v27 }
  0x3a   :  { %645 = vmatprep.subr.mxu1 %v809_v0  ;;  %656 = vmatprep.subr.mxu0 %v809_v0 }
  0x3b   :  { %646 = vmatpush3.msra.mxu1 %v134_v29  ;;  %657 = vmatpush3.msra.mxu0 %v237_v33  ;;  %v409_v33 = vld [vmem:[#allocation4 + $0x210] sm:$0xff] }
  0x3c   :  { %685 = vmatprep.subr.mxu1 %v809_v0  ;;  %658 = vmatprep.subr.mxu0 %v809_v0 }
  0x3d   :  { %659 = vmatpush3.msra.mxu0 %v236_v34  ;;  %v408_v34 = vld [vmem:[#allocation4 + $0x208] sm:$0xff] }
  0x3e   :  { %660 = vmatprep.subr.mxu0 %v809_v0 }
  0x3f   :  { %661 = vmatpush3.msra.mxu0 %v235_v35  ;;  %v407_v35 = vld [vmem:[#allocation4 + $0x200] sm:$0xff] }
  0x40   :  { %662 = vmatprep.subr.mxu0 %v809_v0 }
  0x41   :  { %663 = vmatpush3.msra.mxu0 %v234_v36  ;;  %v334_v36 = vsub.s32 3, %v881_v44 }
  0x42   :  { %664 = vmatprep.subr.mxu0 %v809_v0 }
  0x43   :  { %665 = vmatpush3.msra.mxu0 %v233_v37  ;;  %v335_v37 = vrot.slane %v884_v46, %v334_v36 }
  0x44   :  { %666 = vmatprep.subr.mxu0 %v809_v0 }
  0x45   :  { %667 = vmatpush3.msra.mxu0 %v232_v38 }
  0x46   :  { %668 = vmatprep.subr.mxu0 %v809_v0 }
  0x47   :  { %669 = vmatpush3.msra.mxu0 %v231_v39 }
  0x48   :  { %670 = vmatprep.subr.mxu0 %v809_v0 }
  0x49   :  { %671 = vmatpush3.msra.mxu0 %v230_v40 }
  0x4a   :  { %672 = vmatprep.subr.mxu0 %v809_v0 }
  0x4b   :  { %673 = vmatpush3.msra.mxu0 %v229_v41 }
  0x4c   :  { %674 = vmatprep.subr.mxu0 %v809_v0 }
  0x4d   :  { %675 = vmatpush3.msra.mxu0 %v228_v42  ;;  %v425_v42 = vsub.s32 4, %v881_v44 }
  0x4e   :  { %676 = vmatprep.subr.mxu0 %v809_v0 }
  0x4f   :  { %677 = vmatpush3.msra.mxu0 %v227_v52  ;;  %v426_v43 = vrot.slane %v884_v46, %v425_v42 }
  0x50   :  { %678 = vmatprep.subr.mxu0 %v809_v0 }
  0x51   :  { %679 = vmatpush3.msra.mxu0 %v226_v53 }
  0x52   :  { %680 = vmatprep.subr.mxu0 %v809_v0 }
  0x53   :  { %681 = vmatpush3.msra.mxu0 %v225_v54 }
  0x54   :  { %720 = vmatprep.subr.mxu0 %v809_v0 }
  0xf3   :  { %v129_v48 = vpop.f32.mrf.mxu0 }
  0xf4   :  { %v130_v49 = vadd.f32 %v129_v48, %v54_v47 }
  0xf5   :  { %v614_v50 = vpop.f32.mrf.mxu0 }
  0xf6   :  { %v133_v51 = vmax.f32 %v130_v49, 0.0 }
  0xf8   :  { %648 = vmatmul.mubr.f32.vlgmr.msra.gmra.mxu1 %v133_v51 }
  0xf9   :  { %717 = vmatprep.mubr.msk.f32.mxu1 %vm810_vm0, %v809_v0  ;;  %686 = vmatpush3.msra.mxu1 %v331_v55 }
  0xfa   :  { %687 = vmatprep.subr.mxu1 %v809_v0 }
  0xfb   :  { %688 = vmatpush3.msra.mxu1 %v330_v56 }
  0xfc   :  { %689 = vmatprep.subr.mxu1 %v809_v0 }
  0xfd   :  { %690 = vmatpush3.msra.mxu1 %v329_v57 }
  0xfe   :  { %691 = vmatprep.subr.mxu1 %v809_v0 }
  0xff   :  { %692 = vmatpush3.msra.mxu1 %v328_v58 }
 0x100   :  { %693 = vmatprep.subr.mxu1 %v809_v0 }
 0x101   :  { %694 = vmatpush3.msra.mxu1 %v327_v59 }
 0x102   :  { %695 = vmatprep.subr.mxu1 %v809_v0 }
 0x103   :  { %696 = vmatpush3.msra.mxu1 %v326_v60 }
 0x104   :  { %697 = vmatprep.subr.mxu1 %v809_v0 }
 0x105   :  { %698 = vmatpush3.msra.mxu1 %v325_v61 }
 0x106   :  { %699 = vmatprep.subr.mxu1 %v809_v0 }
 0x107   :  { %700 = vmatpush3.msra.mxu1 %v324_v62 }
 0x108   :  { %701 = vmatprep.subr.mxu1 %v809_v0 }
 0x109   :  { %702 = vmatpush3.msra.mxu1 %v323_v63 }
 0x10a   :  { %703 = vmatprep.subr.mxu1 %v809_v0 }
 0x10b   :  { %704 = vmatpush3.msra.mxu1 %v322_v1 }
 0x10c   :  { %705 = vmatprep.subr.mxu1 %v809_v0 }
 0x10d   :  { %706 = vmatpush3.msra.mxu1 %v321_v2 }
 0x10e   :  { %707 = vmatprep.subr.mxu1 %v809_v0 }
 0x10f   :  { %708 = vmatpush3.msra.mxu1 %v320_v3 }
 0x110   :  { %709 = vmatprep.subr.mxu1 %v809_v0 }
 0x111   :  { %710 = vmatpush3.msra.mxu1 %v319_v4 }
 0x112   :  { %711 = vmatprep.subr.mxu1 %v809_v0 }
 0x113   :  { %712 = vmatpush3.msra.mxu1 %v318_v11 }
 0x114   :  { %713 = vmatprep.subr.mxu1 %v809_v0 }
 0x115   :  { %714 = vmatpush3.msra.mxu1 %v317_v12 }
 0x116   :  { %715 = vmatprep.subr.mxu1 %v809_v0 }
 0x117   :  { %716 = vmatpush3.msra.mxu1 %v316_v13 }
 0x1b8   :  { %v220_v7 = vpop.f32.mrf.mxu1 }
 0x1b9   :  { %v221_v8 = vadd.f32 %v220_v7, %v153_v6 }
 0x1ba   :  { %v649_v9 = vpop.f32.mrf.mxu1 }
 0x1bb   :  { %v224_v10 = vmax.f32 %v221_v8, 0.0 }
 0x1bd   :  { %683 = vmatmul.mubr.f32.vlgmr.msra.gmra.mxu0 %v224_v10 }
 0x1be   :  { %752 = vmatprep.mubr.msk.f32.mxu0 %vm810_vm0, %v809_v0  ;;  %721 = vmatpush3.msra.mxu0 %v422_v14 }
 0x1bf   :  { %722 = vmatprep.subr.mxu0 %v809_v0 }
 0x1c0   :  { %723 = vmatpush3.msra.mxu0 %v421_v15 }
 0x1c1   :  { %724 = vmatprep.subr.mxu0 %v809_v0 }
 0x1c2   :  { %725 = vmatpush3.msra.mxu0 %v420_v16 }
 0x1c3   :  { %726 = vmatprep.subr.mxu0 %v809_v0 }
 0x1c4   :  { %727 = vmatpush3.msra.mxu0 %v419_v17 }
 0x1c5   :  { %728 = vmatprep.subr.mxu0 %v809_v0 }
 0x1c6   :  { %729 = vmatpush3.msra.mxu0 %v418_v18 }
 0x1c7   :  { %730 = vmatprep.subr.mxu0 %v809_v0 }
 0x1c8   :  { %731 = vmatpush3.msra.mxu0 %v417_v19 }
 0x1c9   :  { %732 = vmatprep.subr.mxu0 %v809_v0 }
 0x1ca   :  { %733 = vmatpush3.msra.mxu0 %v416_v20 }
 0x1cb   :  { %734 = vmatprep.subr.mxu0 %v809_v0 }
 0x1cc   :  { %735 = vmatpush3.msra.mxu0 %v415_v21 }
 0x1cd   :  { %736 = vmatprep.subr.mxu0 %v809_v0 }
 0x1ce   :  { %737 = vmatpush3.msra.mxu0 %v414_v22 }
 0x1cf   :  { %738 = vmatprep.subr.mxu0 %v809_v0 }
 0x1d0   :  { %739 = vmatpush3.msra.mxu0 %v413_v23 }
 0x1d1   :  { %740 = vmatprep.subr.mxu0 %v809_v0 }
 0x1d2   :  { %741 = vmatpush3.msra.mxu0 %v412_v24 }
 0x1d3   :  { %742 = vmatprep.subr.mxu0 %v809_v0 }
 0x1d4   :  { %743 = vmatpush3.msra.mxu0 %v411_v25 }
 0x1d5   :  { %744 = vmatprep.subr.mxu0 %v809_v0 }
 0x1d6   :  { %745 = vmatpush3.msra.mxu0 %v410_v26 }
 0x1d7   :  { %746 = vmatprep.subr.mxu0 %v809_v0 }
 0x1d8   :  { %747 = vmatpush3.msra.mxu0 %v409_v33 }
 0x1d9   :  { %748 = vmatprep.subr.mxu0 %v809_v0 }
 0x1da   :  { %749 = vmatpush3.msra.mxu0 %v408_v34 }
 0x1db   :  { %750 = vmatprep.subr.mxu0 %v809_v0 }
 0x1dc   :  { %751 = vmatpush3.msra.mxu0 %v407_v35 }
 0x27d   :  { %v311_v29 = vpop.f32.mrf.mxu0 }
 0x27e   :  { %v312_v30 = vadd.f32 %v311_v29, %v244_v28 }
 0x27f   :  { %v684_v31 = vpop.f32.mrf.mxu0 }
 0x280   :  { %v315_v32 = vmax.f32 %v312_v30, 0.0 }
 0x282   :  { %718 = vmatmul.mubr.f32.vlgmr.msra.gmra.mxu1 %v315_v32 }
 0x342   :  { %v402_v38 = vpop.f32.mrf.mxu1 }
 0x343   :  { %v403_v39 = vadd.f32 %v402_v38, %v335_v37 }
 0x344   :  { %v719_v40 = vpop.f32.mrf.mxu1 }
 0x345   :  { %v406_v41 = vmax.f32 %v403_v39, 0.0 }
 0x347   :  { %753 = vmatmul.mubr.f32.vlgmr.msra.gmra.mxu0 %v406_v41 }
 0x407   :  { %v493_v45 = vpop.f32.mrf.mxu0 }
 0x408   :  { %v494_v47 = vadd.f32 %v493_v45, %v426_v43 }
 0x409   :  { %v754_v48 = vpop.f32.mrf.mxu0 }
 0x40a   :  { %498 = vst.msk [vmem:[%s937_s2] sm:$0xff] %vm497_vm3, %v494_v47 }
 0x40b   :  { %503 = vsyncpa [#allocation3], 1 }
 0x40c   :  { %504 = vsyncpa [#allocation5], 1 }

</bundles_post_ra>
